<compile_context>
chip_gen: v5e
topology: v5e:2x2
jax: 0.10.0
libtpu: 0.0.40
codegen_flags: <defaults>
</compile_context>

<pallas_src>
import jax
import jax.numpy as jnp
from jax import lax
from jax.experimental import pallas as pl
from jax.experimental.pallas import tpu as pltpu


def _round_up(x: int, m: int) -> int:
    return (x + m - 1) // m * m


def _choose_tile(n: int, t_max: int) -> tuple[int, int]:
    """Pick tokens-per-tile: multiple of 8, <= t_max, balanced across tiles to
    minimise tail padding, and >= 2 tiles when possible so the 'parallel' grid
    axis actually feeds both v7x TensorCores (harmless on v5e/v6e)."""
    t_max = max(8, (t_max // 8) * 8)
    num_tiles = max(1, -(-n // t_max))
    if num_tiles == 1 and n > 8:
        num_tiles = 2
    t = _round_up(-(-n // num_tiles), 8)
    return t, num_tiles


# ---------------------------------------------------------------------------
# Small-vocab path: VMEM-resident table, (T, Dpad) token tiles, MXU one-hot.
# ---------------------------------------------------------------------------
def _embed_onehot_kernel(ids_ref, table_ref, out_ref):
    """ids_ref: (T, 1) int32; table_ref: (V, Dpad) resident; out_ref: (T, Dpad)."""
    v = table_ref.shape[0]
    t = ids_ref.shape[0]
    ids = jnp.clip(ids_ref[...], 0, v - 1)                 # (T, 1)
    iota = lax.broadcasted_iota(jnp.int32, (t, v), 1)       # (T, V)
    onehot = (ids == iota).astype(table_ref.dtype)          # (T, V) exact 1.0/0.0
    out_ref[...] = jnp.dot(
        onehot, table_ref[...], preferred_element_type=jnp.float32
    ).astype(out_ref.dtype)


# ---------------------------------------------------------------------------
# Mid/large-vocab path: batched manual-DMA row gather (table stays in HBM).
# ---------------------------------------------------------------------------
def _embed_gather_kernel(ids_ref, table_ref, out_ref, staging_ref, sems):
    """ids_ref: (Npad,) int32 in SMEM (scalar prefetch); table_ref: HBM (V, Dpad);
    out_ref / staging_ref: (T, Dpad) VMEM; sems: (T,) DMA semaphores."""
    t = out_ref.shape[0]
    base = pl.program_id(0) * t
    copies = []
    for j in range(t):                       # static unroll: T row DMAs in flight
        row = ids_ref[base + j]
        cp = pltpu.make_async_copy(
            table_ref.at[pl.ds(row, 1), :],
            staging_ref.at[pl.ds(j, 1), :],
            sems.at[j],
        )
        cp.start()
        copies.append(cp)
    for cp in copies:
        cp.wait()
    out_ref[...] = staging_ref[...]          # one dense (T, Dpad) store per step


# ---------------------------------------------------------------------------
# Wrapper
# ---------------------------------------------------------------------------
def input_embedding(
    ids: jax.Array,
    table: jax.Array,
    *,
    max_onehot_vocab: int = 1024,            # one-hot matmul past ~1K rows is
    resident_table_bytes: int = 8 * 1024 * 1024,  # far past the memory roofline
    onehot_bytes_budget: int = 2 * 1024 * 1024,   # target size of the (T,V) one-hot
    gather_tokens_per_step: int = 64,        # rows DMA'd per step on gather path
) -> jax.Array:
    """Pallas equivalent of nn.Embedding(vocab_size, embedding_dim)(ids)."""
    assert ids.dtype in (jnp.int32, jnp.int64), ids.dtype
    batch, seq = ids.shape
    vocab, dim = table.shape
    n = batch * seq
    ids_flat = ids.reshape(n).astype(jnp.int32)

    # Lane-dense output stores (unmasked vst) + better MXU N fill: pad dim to a
    # multiple of 128 and slice it off at the end.  No-op when dim % 128 == 0.
    dim_pad = _round_up(dim, 128)
    if dim_pad != dim:
        # TODO(synk): for very large tables this pads the whole table in HBM
        # once; a dim-padded weight layout upstream would avoid that copy.
        table = jnp.pad(table, ((0, 0), (0, dim_pad - dim)))
    itemsize = table.dtype.itemsize
    table_bytes = vocab * dim_pad * itemsize

    if vocab <= max_onehot_vocab and table_bytes <= resident_table_bytes:
        # ---- resident-table one-hot-matmul path -----------------------------
        t_max = min(1024, max(8, onehot_bytes_budget // (4 * vocab)))
        t, num_tiles = _choose_tile(n, t_max)
        n_pad = t * num_tiles
        ids_col = jnp.pad(ids_flat, (0, n_pad - n)).reshape(n_pad, 1)

        vmem_limit = min(
            48 * 1024 * 1024,                         # conservative for v7x (64 MiB)
            max(
                32 * 1024 * 1024,
                table_bytes                           # single-buffered resident table
                + 2 * t * dim_pad * itemsize          # double-buffered out tiles
                + 2 * t * 4                           # double-buffered ids tiles
                + 3 * t * vocab * 4                   # iota / one-hot temporaries
                + (4 << 20),                          # slack
            ),
        )

        out_flat = pl.pallas_call(
            _embed_onehot_kernel,
            out_shape=jax.ShapeDtypeStruct((n_pad, dim_pad), table.dtype),
            grid=(num_tiles,),
            in_specs=[
                # Token-id column tile for this grid step.
                pl.BlockSpec((t, 1), lambda i: (i, 0)),
                # Whole table; constant block index -> DMA'd once and kept
                # resident; Buffered(1) avoids double-buffering a block that
                # never changes (halves its VMEM footprint).
                pl.BlockSpec((vocab, dim_pad), lambda i: (0, 0),
                             pipeline_mode=pl.Buffered(1)),
            ],
            out_specs=pl.BlockSpec((t, dim_pad), lambda i: (i, 0)),
            compiler_params=pltpu.CompilerParams(
                dimension_semantics=("parallel",),    # independent tiles
                vmem_limit_bytes=vmem_limit,
            ),
        )(ids_col, table)
        return out_flat[:n, :dim].reshape(batch, seq, dim)

    # ---- batched manual-DMA gather path -------------------------------------
    t, num_tiles = _choose_tile(n, gather_tokens_per_step)
    n_pad = t * num_tiles
    ids_safe = jnp.pad(jnp.clip(ids_flat, 0, vocab - 1), (0, n_pad - n))

    vmem_limit = min(
        48 * 1024 * 1024,
        max(16 * 1024 * 1024, 3 * t * dim_pad * itemsize + (4 << 20)),
    )

    out_flat = pl.pallas_call(
        _embed_gather_kernel,
        out_shape=jax.ShapeDtypeStruct((n_pad, dim_pad), table.dtype),
        grid_spec=pltpu.PrefetchScalarGridSpec(
            num_scalar_prefetch=1,                    # ids -> SMEM
            grid=(num_tiles,),
            in_specs=[pl.BlockSpec(memory_space=pl.ANY)],  # table stays in HBM
            out_specs=pl.BlockSpec((t, dim_pad), lambda i, ids: (i, 0)),
            scratch_shapes=[
                pltpu.VMEM((t, dim_pad), table.dtype),     # DMA staging tile
                pltpu.SemaphoreType.DMA((t,)),
            ],
        ),
        compiler_params=pltpu.CompilerParams(
            dimension_semantics=("parallel",),        # disjoint output rows
            vmem_limit_bytes=vmem_limit,
        ),
    )(ids_safe, table)
    return out_flat[:n, :dim].reshape(batch, seq, dim)


if __name__ == "__main__":
    key = jax.random.PRNGKey(0)
    k_w, k_ids, k_w2, k_ids2 = jax.random.split(key, 4)

    # InputEmbedding(vocab_size=64, embedding_dim=128), ids (batch=2, seq=8):
    # exercises the VMEM-resident one-hot-matmul path.
    vocab_size, embedding_dim, batch, seq = 64, 128, 2, 8
    table = jax.random.normal(k_w, (vocab_size, embedding_dim), dtype=jnp.float32)
    ids = jax.random.randint(k_ids, (batch, seq), 0, vocab_size, dtype=jnp.int32)
    out = jax.block_until_ready(input_embedding(ids, table))
    assert out.shape == (batch, seq, embedding_dim)
    assert jnp.allclose(out, table[ids]), "resident-path mismatch vs reference"

    # Larger vocab (> max_onehot_vocab): exercises the batched manual-DMA gather.
    vocab_big = 2048
    table_big = jax.random.normal(k_w2, (vocab_big, embedding_dim), dtype=jnp.float32)
    ids_big = jax.random.randint(k_ids2, (batch, seq), 0, vocab_big, dtype=jnp.int32)
    out_big = jax.block_until_ready(input_embedding(ids_big, table_big))
    assert out_big.shape == (batch, seq, embedding_dim)
    assert jnp.allclose(out_big, table_big[ids_big]), "gather-path mismatch vs reference"

    print("KERNEL_OK")
</pallas_src>

<mosaic_0001>
module attributes {stable_mosaic.version = 11 : i64} {
  func.func @_embed_onehot_kernel(%arg0: i32, %arg1: memref<8x1xi32, #tpu.memory_space<vmem>>, %arg2: memref<64x128xf32, #tpu.memory_space<vmem>>, %arg3: memref<8x128xf32, #tpu.memory_space<vmem>>) attributes {dimension_semantics = [#tpu.dimension_semantics<parallel>], iteration_bounds = array<i64: 2>, scalar_prefetch = 0 : i64, scratch_operands = 0 : i64, tpu.core_type = #tpu.core_type<tc>, window_params = [{transform_indices = @transform_0, window_bounds = array<i64: 8, 1>}, {pipeline_mode = #tpu.pipeline_mode<synchronous>, transform_indices = @transform_1, window_bounds = array<i64: 64, 128>}, {transform_indices = @transform_2, window_bounds = array<i64: 8, 128>}]} {
    %c0 = arith.constant 0 : index
    %c0_0 = arith.constant 0 : index
    %0 = vector.load %arg1[%c0, %c0_0] : memref<8x1xi32, #tpu.memory_space<vmem>>, vector<8x1xi32>
    %c0_i32 = arith.constant 0 : i32
    %c63_i32 = arith.constant 63 : i32
    %1 = vector.broadcast %c0_i32 : i32 to vector<8x1xi32>
    %2 = arith.maxsi %1, %0 : vector<8x1xi32>
    %3 = vector.broadcast %c63_i32 : i32 to vector<8x1xi32>
    %4 = arith.minsi %3, %2 : vector<8x1xi32>
    %5 = tpu.iota {dimensions = array<i32: 1>} : vector<8x64xi32>
    %6 = vector.broadcast %4 : vector<8x1xi32> to vector<8x64xi32>
    %7 = arith.cmpi eq, %6, %5 : vector<8x64xi32>
    %8 = arith.extui %7 : vector<8x64xi1> to vector<8x64xi32>
    %9 = arith.sitofp %8 : vector<8x64xi32> to vector<8x64xf32>
    %c0_1 = arith.constant 0 : index
    %c0_2 = arith.constant 0 : index
    %10 = vector.load %arg2[%c0_1, %c0_2] : memref<64x128xf32, #tpu.memory_space<vmem>>, vector<64x128xf32>
    %cst = arith.constant dense<0.000000e+00> : vector<8x128xf32>
    %11 = tpu.matmul %9, %10, %cst {dimension_numbers = #tpu.dot_dimension_numbers<[1], [0], [0], [1], [0, 0, 1, 1], [], []>} : vector<8x64xf32>, vector<64x128xf32>, vector<8x128xf32> -> vector<8x128xf32>
    %c0_3 = arith.constant 0 : index
    %c0_4 = arith.constant 0 : index
    %12 = vector.load %arg3[%c0_3, %c0_4] : memref<8x128xf32, #tpu.memory_space<vmem>>, vector<8x128xf32>
    tpu.vector_store %arg3[%c0_3, %c0_4], %11 {strides = array<i32>} : memref<8x128xf32, #tpu.memory_space<vmem>>, vector<8x128xf32>,
    return
  }
  func.func @transform_0(%arg0: i32) -> (i32, i32) {
    %c0_i32 = arith.constant 0 : i32
    %c0_i32_0 = arith.constant 0 : i32
    return %arg0, %c0_i32 : i32, i32
  }
  func.func @transform_1(%arg0: i32) -> (i32, i32) {
    %c0_i32 = arith.constant 0 : i32
    %c0_i32_0 = arith.constant 0 : i32
    %c0_i32_1 = arith.constant 0 : i32
    return %c0_i32, %c0_i32_0 : i32, i32
  }
  func.func @transform_2(%arg0: i32) -> (i32, i32) {
    %c0_i32 = arith.constant 0 : i32
    %c0_i32_0 = arith.constant 0 : i32
    return %arg0, %c0_i32 : i32, i32
  }
}

</mosaic_0001>

<bundles_post_ra>
// kernel: tpu_custom_call.1
= control target key start
LH: loop header
LB: loop body
LE: loop exit
PB: predicated region body
PF: predicated region fallthrough
CT: control target
= control target key end

     0   :  { %7 = vsyncpa [#allocation3], 0  ;;  %s571_s0 = inlined_call_operand.vmem [shape: s32[16,1], index: 0, kind: input, shape index: {}]   ;;  %s572_s1 = inlined_call_operand.hbm [shape: f32[64,128], index: 1, kind: input, shape index: {}]   ;;  %s573_s2 = inlined_call_operand.hbm [shape: f32[16,128], index: 2, kind: output, shape index: {}]  }
   0x1   :  { %8 = vsyncpa [#allocation4], 0 }
   0x2   :  { %10 = vsyncpa [#allocation4 + $0x1], 0  ;;  %s476_s9 = smov 0   ;;  %s478_s10 = smov 0  }
   0x3   :  { %s480_s11 = smov 0   ;;  %s482_s12 = smov 0  }
   0x4 LB: > { %s497_s13 = sadd.s32 4294967295, %s454_s12   ;;  %s289_s14 = sadd.s32 4294967294, %s454_s12   ;;  %s454_s12 = sphi %s482_s12, %s579_s12   ;;  %s450_s11 = sphi %s480_s11, %s578_s11   ;;  %s446_s10 = sphi %s478_s10, %s577_s10   ;;  %s442_s9 = sphi %s476_s9, %s576_s9  }
   0x5   : > { %s501_s15 = sadd.s32 1, %s454_s12   ;;  %s70_s16 = sadd.s32 1, %s450_s11 }
   0x6   : > { %s67_s17 = ssub.s32 %s454_s12, %s501_s15  ;;  %p80_p0 = scmp.ne.s32.totalorder %s450_s11, %s446_s10 }
   0x7   : > { %p68_p1 = scmp.eq.s32.totalorder %s67_s17, 0  ;;  %p81_p2 = scmp.eq.s32.totalorder %s497_s13, 1 }
   0x8   : > { %p86_p3 = scmp.ne.s32.totalorder %s446_s10, %s442_s9  ;;  %p87_p4 = scmp.eq.s32.totalorder %s289_s14, 1 }
   0x9   : > { %s512_s18 = scalar_select %p68_p1, %s450_s11, %s70_s16  }
   0xa   : > { %p514_p5 = por %p81_p2, %p80_p0  ;;  %p518_p6 = por %p87_p4, %p86_p3 }
   0xb   : > { %p290_p7 = scmp.ge.s32.totalorder %s454_s12, 1  ;;  %p94_p8 = scmp.lt.s32.totalorder %s454_s12, 3 }
   0xc   : > { %p317_p9 = scmp.eq.s32.totalorder %s497_s13, 0  ;;  %s105_s23 = sshll.u32 %s572_s1, 4  ;;  %s106_s23 = int_to_ptr.hbm [resolvable:$true] %s105_s23 }
   0xd   : > { %p95_p10 = pnand %p290_p7, %p94_p8  ;;  %s456_s24 = smov [#allocation2]  }
   0xe   : > { %s107_s25 = sshll.u32 %s456_s24, 4  ;;  %s457_s26 = smov 128   ;;  %s108_s25 = int_to_ptr.vmem [resolvable:$true] %s107_s25 }
   0xf   : > { %p309_p11 = pneg %p95_p10  ;;  %s458_s27 = smov 8  }
  0x10   : > { %130 = sbr.rel (%p95_p10) target bundleno = 279 (0x117), region = 28 }
  0x11   : > { %p310_p12 = pnand %p317_p9, %p309_p11 }
  0x13   : > { %312 = dma.hbm_to_vmem [thread:$0]  (!%p310_p12), %s106_s23, 1024, %s108_s25, [#allocation3], %s457_s26, %s457_s26, %s458_s27  }
  0x15   : > { %433 = dma.done.wait (%p317_p9), [#allocation3], 1024  }
  0x16   : > { %435 = vsyncadd (%p317_p9), [#allocation3], 4294966272  ;;  %p152_p13 = scmp.lt.s32.totalorder %s497_s13, 1  ;;  %v459_v0 = vmov 0   ;;  %v176_v2 = vld [vmem:[#allocation2 + $0x38] sm:$0xff]  ;;  %v175_v3 = vld [vmem:[#allocation2 + $0x30] sm:$0xff]  ;;  %v161_v12 = vlaneseq }
  0x17   : > { %357 = vset.pattern.permute.xlu0 %v459_v0  ;;  %189 = vmatpush.msra.mxu0 %v176_v2  ;;  %v174_v5 = vld [vmem:[#allocation2 + $0x28] sm:$0xff]  ;;  %v173_v7 = vld [vmem:[#allocation2 + $0x20] sm:$0xff]  ;;  %v172_v8 = vld [vmem:[#allocation2 + $0x18] sm:$0xff]  ;;  %vm177_vm2 = vcmask 523264   ;;  %v460_v15 = vmov 0.0   ;;  %s149_s5 = sand.u32 1, %s446_s10  }
  0x18   : > { %s153_s28 = scalar_select %p152_p13, %s497_s13, 1  ;;  %v171_v9 = vld [vmem:[#allocation2 + $0x10] sm:$0xff]  ;;  %v170_v10 = vld [vmem:[#allocation2 + $0x8] sm:$0xff]  ;;  %v169_v11 = vld [vmem:[#allocation2] sm:$0xff]  ;;  %v162_v13 = vand.u32 127, %v161_v12 }
  0x19   : > { %190 = vmatpush.msra.mxu0 %v175_v3  ;;  %s295_s6 = sshll.u32 %s149_s5, 3  ;;  %s300_s7 = sshll.u32 %s497_s13, 3 }
  0x1a   : > { %s296_s29 = sshll.u32 %s153_s28, 3  ;;  %s213_s16 = scalar_lea.hbm %s573_s2, %s300_s7 }
  0x1b   : > { %s155_s4 = scalar_lea.vmem %s571_s0, %s296_s29  ;;  %191 = vmatpush.msra.mxu0 %v174_v5  ;;  %s151_s17 = scalar_lea.vmem [#allocation5], %s295_s6 }
  0x1c   : > { %v156_v1 = vld [vmem:[%s155_s4] sm:$0xff]  ;;  %s215_s21 = sshll.u32 %s151_s17, 4  ;;  %s217_s22 = sshll.u32 %s213_s16, 4  ;;  %s216_s21 = int_to_ptr.vmem [resolvable:$true] %s215_s21  ;;  %s218_s22 = int_to_ptr.hbm [resolvable:$true] %s217_s22 }
  0x1d   : > { %vm157_vm0 = vcmp.gt.s32.totalorder %v156_v1, 0  ;;  %192 = vmatpush.msra.mxu0 %v173_v7  ;;  %s203_s23 = scalar_lea.sflag [#allocation4], %s149_s5  ;;  %s402_s24 = sshra.s32 %s218_s22, 4  ;;  %s403_s24 = int_to_ptr.hbm [resolvable:$true] %s402_s24 }
  0x1e   : > { %v158_v4 = vsel %vm157_vm0, %v156_v1, 0  ;;  %s404_s25 = scalar_lea.hbm %s403_s24, 8  ;;  %s408_s27 = scalar_lea.hbm %s573_s2, 16 }
  0x1f   : > { %vm159_vm1 = vcmp.lt.s32.totalorder %v158_v4, 63  ;;  %193 = vmatpush.msra.mxu0 %v172_v8  ;;  %p405_p0 = scmp.ne.s32.totalorder %s403_s24, %s404_s25  ;;  %p409_p3 = scmp.lt.s32.totalorder %s403_s24, %s573_s2 }
  0x20   : > { %v160_v6 = vsel %vm159_vm1, %v158_v4, 63  ;;  %p410_p4 = scmp.lt.s32.totalorder %s408_s27, %s404_s25 }
  0x21   : > { %164 = vperm.xlu0 %357, %v160_v6   ;;  %194 = vmatpush.msra.mxu0 %v171_v9  ;;  %p406_p1 = pnand %p405_p0, %p514_p5 }
  0x22   : > { %p411_p7 = por %p410_p4, %p409_p3 }
  0x23   : > { %195 = vmatpush.msra.mxu0 %v170_v10  ;;  %p407_p2 = pneg %p406_p1 }
  0x25   : > { %196 = vmatpush.msra.mxu0 %v169_v11  ;;  %p412_p8 = pnand %p411_p7, %p407_p2 }
  0x93   : > { %v165_v14 = vpop.permute.xlu0 %164 }
  0x94   : > { %vm166_vm3 = vcmp.eq.s32.totalorder %v165_v14, %v162_v13 }
  0x95   : > { %v297_v16 = vsel %vm166_vm3, 1.0, %v460_v15 }
  0x96   : > { %298 = vmatmul.msk.f32.vlgmr.msra.gmra.mxu0 %vm177_vm2, %v297_v16 }
 0x113   : > { %v198_v17 = vpop.f32.mrf.mxu0 }
 0x114   : > { %201 = vst [vmem:[%s151_s17] sm:$0xff] %v198_v17 }
 0x115   : > { %415 = shalt.err (!%p412_p8)
}
 0x116   : > { %307 = dma.vmem_to_hbm [thread:$0]  (%p514_p5), %s216_s21, 128, %s218_s22, %s203_s23  }
 0x117 PF: > { %p319_p9 = scmp.ge.s32.totalorder %s454_s12, 2  ;;  %s229_s30 = sand.u32 1, %s442_s9  }
 0x118   : > { %s230_s3 = scalar_lea.sflag [#allocation4], %s229_s30 }
 0x119   : > { %p314_p10 = pnand %p319_p9, %p518_p6 }
 0x11b   : > { %p315_p11 = pneg %p314_p10 }
 0x11d   : > { %437 = dma.done.wait (%p315_p11), %s230_s3, 128  }
 0x11e   : > { %439 = vsyncadd (%p315_p11), %s230_s3, 4294967168  ;;  %p13_p12 = scmp.ge.s32.totalorder %s501_s15, 4   ;;  %s576_s9 = smov %s446_s10 }
 0x11f   : > { %s577_s10 = smov %s450_s11  ;;  %s578_s11 = smov %s512_s18 }
 0x120   : > { %s579_s12 = smov %s501_s15  ;;  %15 = sbr.rel (!%p13_p12) target bundleno = 4 (0x4), region = 68 }
 0x125   :  { %236 = vsyncpa [#allocation3], 1 }
 0x126   :  { %238 = vsyncpa [#allocation3 + $0x1], 1 }
 0x127   :  { %239 = vsyncpa [#allocation4], 1 }
 0x128   :  { %241 = vsyncpa [#allocation4 + $0x1], 1 }

</bundles_post_ra>
